<compile_context>
chip_gen: v5e
topology: v5e:2x2
jax: 0.10.0
libtpu: 0.0.40
codegen_flags: <defaults>
</compile_context>

<pallas_src>
import jax
import jax.numpy as jnp
from jax.experimental import pallas as pl
from jax.experimental.pallas import tpu as pltpu

_LANE = 128       # vreg lane width
_SUBLANE = 8      # f32 sublanes per vreg
_TB_MAX = 512     # batch tile: multiple of 256 (v6e/v7x MXU) and 128 (v5e MXU)
_NEG_BIG = -1e30  # bias for padded logit columns -> exp() underflows to 0


def _round_up(n, m):
    return ((n + m - 1) // m) * m


def colournet_kernel(x_ref, w1t_ref, b1_ref, w2t_ref, b2_ref, o_ref):
    x = x_ref[...]          # (TB, K)      f32, K tiny (3)
    w1t = w1t_ref[...]      # (K, H_PAD)   f32

    # fc1 + bias as an unrolled rank-1 VPU update: avoids a K=3 MXU matmul and
    # any K padding of x.  Everything stays in f32 (exact fc1).
    h = b1_ref[...] + x[:, 0:1] * w1t[0:1, :]
    for i in range(1, x.shape[1]):                     # static unroll over K
        h = h + x[:, i:i + 1] * w1t[i:i + 1, :]
    h = jnp.maximum(h, 0.0)                            # ReLU (f32, VPU)

    # fc2 on the MXU: bf16 operands, f32 accumulation.  Bias added in f32;
    # padded output columns carry a -1e30 bias.
    logits = (
        jnp.dot(h.astype(jnp.bfloat16), w2t_ref[...],
                preferred_element_type=jnp.float32)
        + b2_ref[...]
    )

    # Numerically stable softmax over dim=1 in f32; padded columns -> exactly 0
    # and drop out of the denominator.  Exact divide (see perf review).
    m = jnp.max(logits, axis=1, keepdims=True)
    e = jnp.exp(logits - m)
    probs = e / jnp.sum(e, axis=1, keepdims=True)

    # Narrow, full-dim store: only the real output columns leave VMEM.
    o_ref[...] = probs[:, : o_ref.shape[1]].astype(o_ref.dtype)


def prepare_params(w1, b1, w2, b2):
    """One-time layout prep (hoisted out of the per-call hot path).

    Returns (w1t, b1p, w2t_bf16, b2p):
      w1t : [K, H_PAD]      f32  (transposed, hidden padded to 128 lanes)
      b1p : [1, H_PAD]      f32
      w2t : [H_PAD, O_PAD]  bf16 (transposed; zero rows/cols for padding)
      b2p : [1, O_PAD]      f32  (-1e30 in padded columns)
    """
    hidden_size, input_size = w1.shape
    output_size = w2.shape[0]
    h_pad = _round_up(hidden_size, _LANE)   # 32  -> 128
    o_pad = _round_up(output_size, _LANE)   # 10  -> 128

    w1t = (
        jnp.zeros((input_size, h_pad), jnp.float32)
        .at[:, :hidden_size]
        .set(w1.T)
    )
    b1p = jnp.zeros((1, h_pad), jnp.float32).at[0, :hidden_size].set(b1)
    w2t = (
        jnp.zeros((h_pad, o_pad), jnp.float32)
        .at[:hidden_size, :output_size]
        .set(w2.T)
    ).astype(jnp.bfloat16)
    b2p = jnp.full((1, o_pad), _NEG_BIG, jnp.float32).at[0, :output_size].set(b2)
    return w1t, b1p, w2t, b2p


def colournet_forward(x, w1t, b1p, w2t, b2p, *, output_size):
    """Fused ColourNet eval-mode forward.  Params must come from prepare_params."""
    batch, input_size = x.shape

    # Batch tiling: single block for small batches, 512-row tiles otherwise.
    tb = batch if batch <= _TB_MAX else _TB_MAX
    b_pad = _round_up(batch, tb)
    x_in = x
    if b_pad != batch:  # only triggers for non-tile-aligned large batches
        x_in = jnp.zeros((b_pad, input_size), x.dtype).at[:batch].set(x)
    grid = (b_pad // tb,)

    out = pl.pallas_call(
        colournet_kernel,
        out_shape=jax.ShapeDtypeStruct((b_pad, output_size), jnp.float32),
        grid=grid,
        in_specs=[
            pl.BlockSpec((tb, input_size), lambda i: (i, 0)),   # x tile
            pl.BlockSpec(w1t.shape, lambda i: (0, 0)),          # resident weights
            pl.BlockSpec(b1p.shape, lambda i: (0, 0)),
            pl.BlockSpec(w2t.shape, lambda i: (0, 0)),
            pl.BlockSpec(b2p.shape, lambda i: (0, 0)),
        ],
        out_specs=pl.BlockSpec((tb, output_size), lambda i: (i, 0)),
        compiler_params=pltpu.CompilerParams(
            dimension_semantics=("parallel",),  # shard batch across TCs (v7x)
        ),
    )(x_in, w1t, b1p, w2t, b2p)

    if b_pad != batch:
        out = out[:batch]
    return out


def init_params(key, input_size, hidden_size, output_size):
    """Deterministic init mimicking nn.Linear default (uniform +/- 1/sqrt(fan_in))."""
    k1, k2, k3, k4 = jax.random.split(key, 4)
    bound1 = 1.0 / jnp.sqrt(input_size)
    bound2 = 1.0 / jnp.sqrt(hidden_size)
    w1 = jax.random.uniform(
        k1, (hidden_size, input_size), jnp.float32, -bound1, bound1
    )
    b1 = jax.random.uniform(k2, (hidden_size,), jnp.float32, -bound1, bound1)
    w2 = jax.random.uniform(
        k3, (output_size, hidden_size), jnp.float32, -bound2, bound2
    )
    b2 = jax.random.uniform(k4, (output_size,), jnp.float32, -bound2, bound2)
    return w1, b1, w2, b2


if __name__ == "__main__":
    # ColourNet(input_size=3, hidden_size=32, output_size=10)
    input_size, hidden_size, output_size = 3, 32, 10

    key = jax.random.PRNGKey(0)
    kx, kp, kxb = jax.random.split(key, 3)
    w1, b1, w2, b2 = init_params(kp, input_size, hidden_size, output_size)

    # One-time layout prep (hoisted out of the hot path per perf review).
    params = prepare_params(w1, b1, w2, b2)
    fwd = jax.jit(colournet_forward, static_argnames=("output_size",))

    def reference(xs):
        h_ref = jnp.maximum(xs @ w1.T + b1, 0.0)
        return jax.nn.softmax(h_ref @ w2.T + b2, axis=1)

    # Toy case (batch=8): single block, grid=(1,).
    x = jax.random.uniform(kx, (8, input_size), jnp.float32)
    out = jax.block_until_ready(fwd(x, *params, output_size=output_size))
    assert out.shape == (8, output_size)
    # tolerance accounts for bf16 MXU operands in fc2 (f32 accumulation)
    assert jnp.allclose(out, reference(x), atol=1e-2, rtol=2e-2)
    assert jnp.allclose(jnp.sum(out, axis=1), 1.0, atol=1e-3)

    # Production-style path: parallel batch grid, 512-row tiles, resident weights.
    xb = jax.random.uniform(kxb, (1024, input_size), jnp.float32)
    outb = jax.block_until_ready(fwd(xb, *params, output_size=output_size))
    assert outb.shape == (1024, output_size)
    assert jnp.allclose(outb, reference(xb), atol=1e-2, rtol=2e-2)
    assert jnp.allclose(jnp.sum(outb, axis=1), 1.0, atol=1e-3)

    print("KERNEL_OK")
</pallas_src>

<mosaic_0001>
module attributes {stable_mosaic.version = 11 : i64} {
  func.func @colournet_kernel(%arg0: i32, %arg1: memref<8x3xf32, #tpu.memory_space<vmem>>, %arg2: memref<3x128xf32, #tpu.memory_space<vmem>>, %arg3: memref<1x128xf32, #tpu.memory_space<vmem>>, %arg4: memref<128x128xbf16, #tpu.memory_space<vmem>>, %arg5: memref<1x128xf32, #tpu.memory_space<vmem>>, %arg6: memref<8x10xf32, #tpu.memory_space<vmem>>) attributes {dimension_semantics = [#tpu.dimension_semantics<parallel>], iteration_bounds = array<i64: 1>, scalar_prefetch = 0 : i64, scratch_operands = 0 : i64, tpu.core_type = #tpu.core_type<tc>, window_params = [{transform_indices = @transform_0, window_bounds = array<i64: 8, 3>}, {pipeline_mode = #tpu.pipeline_mode<synchronous>, transform_indices = @transform_1, window_bounds = array<i64: 3, 128>}, {pipeline_mode = #tpu.pipeline_mode<synchronous>, transform_indices = @transform_2, window_bounds = array<i64: 1, 128>}, {pipeline_mode = #tpu.pipeline_mode<synchronous>, transform_indices = @transform_3, window_bounds = array<i64: 128, 128>}, {pipeline_mode = #tpu.pipeline_mode<synchronous>, transform_indices = @transform_4, window_bounds = array<i64: 1, 128>}, {transform_indices = @transform_5, window_bounds = array<i64: 8, 10>}]} {
    %c0 = arith.constant 0 : index
    %c0_0 = arith.constant 0 : index
    %0 = vector.load %arg1[%c0, %c0_0] : memref<8x3xf32, #tpu.memory_space<vmem>>, vector<8x3xf32>
    %c0_1 = arith.constant 0 : index
    %c0_2 = arith.constant 0 : index
    %1 = vector.load %arg2[%c0_1, %c0_2] : memref<3x128xf32, #tpu.memory_space<vmem>>, vector<3x128xf32>
    %c0_3 = arith.constant 0 : index
    %c0_4 = arith.constant 0 : index
    %2 = vector.load %arg3[%c0_3, %c0_4] : memref<1x128xf32, #tpu.memory_space<vmem>>, vector<1x128xf32>
    %3 = vector.extract_strided_slice %0 {offsets = [0, 0], sizes = [8, 1], strides = [1, 1]} : vector<8x3xf32> to vector<8x1xf32>
    %4 = vector.extract_strided_slice %1 {offsets = [0, 0], sizes = [1, 128], strides = [1, 1]} : vector<3x128xf32> to vector<1x128xf32>
    %5 = vector.broadcast %3 : vector<8x1xf32> to vector<8x128xf32>
    %6 = vector.broadcast %4 : vector<1x128xf32> to vector<8x128xf32>
    %7 = arith.mulf %5, %6 : vector<8x128xf32>
    %8 = vector.broadcast %2 : vector<1x128xf32> to vector<8x128xf32>
    %9 = arith.addf %8, %7 : vector<8x128xf32>
    %10 = vector.extract_strided_slice %0 {offsets = [0, 1], sizes = [8, 1], strides = [1, 1]} : vector<8x3xf32> to vector<8x1xf32>
    %11 = vector.extract_strided_slice %1 {offsets = [1, 0], sizes = [1, 128], strides = [1, 1]} : vector<3x128xf32> to vector<1x128xf32>
    %12 = vector.broadcast %10 : vector<8x1xf32> to vector<8x128xf32>
    %13 = vector.broadcast %11 : vector<1x128xf32> to vector<8x128xf32>
    %14 = arith.mulf %12, %13 : vector<8x128xf32>
    %15 = arith.addf %9, %14 : vector<8x128xf32>
    %16 = vector.extract_strided_slice %0 {offsets = [0, 2], sizes = [8, 1], strides = [1, 1]} : vector<8x3xf32> to vector<8x1xf32>
    %17 = vector.extract_strided_slice %1 {offsets = [2, 0], sizes = [1, 128], strides = [1, 1]} : vector<3x128xf32> to vector<1x128xf32>
    %18 = vector.broadcast %16 : vector<8x1xf32> to vector<8x128xf32>
    %19 = vector.broadcast %17 : vector<1x128xf32> to vector<8x128xf32>
    %20 = arith.mulf %18, %19 : vector<8x128xf32>
    %21 = arith.addf %15, %20 : vector<8x128xf32>
    %cst = arith.constant 0.000000e+00 : f32
    %22 = vector.broadcast %cst : f32 to vector<8x128xf32>
    %23 = arith.maximumf %21, %22 : vector<8x128xf32>
    %24 = arith.truncf %23 : vector<8x128xf32> to vector<8x128xbf16>
    %c0_5 = arith.constant 0 : index
    %c0_6 = arith.constant 0 : index
    %25 = vector.load %arg4[%c0_5, %c0_6] : memref<128x128xbf16, #tpu.memory_space<vmem>>, vector<128x128xbf16>
    %cst_7 = arith.constant dense<0.000000e+00> : vector<8x128xf32>
    %26 = tpu.matmul %24, %25, %cst_7 {dimension_numbers = #tpu.dot_dimension_numbers<[1], [0], [0], [1], [0, 0, 1, 1], [], []>} : vector<8x128xbf16>, vector<128x128xbf16>, vector<8x128xf32> -> vector<8x128xf32>
    %c0_8 = arith.constant 0 : index
    %c0_9 = arith.constant 0 : index
    %27 = vector.load %arg5[%c0_8, %c0_9] : memref<1x128xf32, #tpu.memory_space<vmem>>, vector<1x128xf32>
    %28 = vector.broadcast %27 : vector<1x128xf32> to vector<8x128xf32>
    %29 = arith.addf %26, %28 : vector<8x128xf32>
    %cst_10 = arith.constant dense<0xFF800000> : vector<8xf32>
    %30 = vector.multi_reduction <maximumf>, %29, %cst_10 [1] : vector<8x128xf32> to vector<8xf32>
    %31 = vector.shape_cast %30 : vector<8xf32> to vector<8x1xf32>
    %32 = vector.broadcast %31 : vector<8x1xf32> to vector<8x128xf32>
    %33 = arith.subf %29, %32 : vector<8x128xf32>
    %34 = math.exp %33 : vector<8x128xf32>
    %cst_11 = arith.constant dense<0.000000e+00> : vector<8xf32>
    %35 = vector.multi_reduction <add>, %34, %cst_11 [1] : vector<8x128xf32> to vector<8xf32>
    %36 = vector.shape_cast %35 : vector<8xf32> to vector<8x1xf32>
    %37 = vector.broadcast %36 : vector<8x1xf32> to vector<8x128xf32>
    %38 = arith.divf %34, %37 : vector<8x128xf32>
    %39 = vector.extract_strided_slice %38 {offsets = [0, 0], sizes = [8, 10], strides = [1, 1]} : vector<8x128xf32> to vector<8x10xf32>
    %c0_12 = arith.constant 0 : index
    %c0_13 = arith.constant 0 : index
    %40 = vector.load %arg6[%c0_12, %c0_13] : memref<8x10xf32, #tpu.memory_space<vmem>>, vector<8x10xf32>
    tpu.vector_store %arg6[%c0_12, %c0_13], %39 {strides = array<i32>} : memref<8x10xf32, #tpu.memory_space<vmem>>, vector<8x10xf32>,
    return
  }
  func.func @transform_0(%arg0: i32) -> (i32, i32) {
    %c0_i32 = arith.constant 0 : i32
    %c0_i32_0 = arith.constant 0 : i32
    return %arg0, %c0_i32 : i32, i32
  }
  func.func @transform_1(%arg0: i32) -> (i32, i32) {
    %c0_i32 = arith.constant 0 : i32
    %c0_i32_0 = arith.constant 0 : i32
    %c0_i32_1 = arith.constant 0 : i32
    return %c0_i32, %c0_i32_0 : i32, i32
  }
  func.func @transform_2(%arg0: i32) -> (i32, i32) {
    %c0_i32 = arith.constant 0 : i32
    %c0_i32_0 = arith.constant 0 : i32
    %c0_i32_1 = arith.constant 0 : i32
    return %c0_i32, %c0_i32_0 : i32, i32
  }
  func.func @transform_3(%arg0: i32) -> (i32, i32) {
    %c0_i32 = arith.constant 0 : i32
    %c0_i32_0 = arith.constant 0 : i32
    %c0_i32_1 = arith.constant 0 : i32
    return %c0_i32, %c0_i32_0 : i32, i32
  }
  func.func @transform_4(%arg0: i32) -> (i32, i32) {
    %c0_i32 = arith.constant 0 : i32
    %c0_i32_0 = arith.constant 0 : i32
    %c0_i32_1 = arith.constant 0 : i32
    return %c0_i32, %c0_i32_0 : i32, i32
  }
  func.func @transform_5(%arg0: i32) -> (i32, i32) {
    %c0_i32 = arith.constant 0 : i32
    %c0_i32_0 = arith.constant 0 : i32
    return %arg0, %c0_i32 : i32, i32
  }
}

</mosaic_0001>

<bundles_post_ra>
// kernel: colournet_forward.1
= control target key start
LH: loop header
LB: loop body
LE: loop exit
PB: predicated region body
PF: predicated region fallthrough
CT: control target
= control target key end

     0   :  { %10 = vsyncpa [#allocation3], 0  ;;  %s353_s0 = inlined_call_operand.vmem [shape: f32[8,3], index: 0, kind: input, shape index: {}]   ;;  %s354_s1 = inlined_call_operand.vmem [shape: f32[3,128], index: 1, kind: input, shape index: {}]   ;;  %s355_s2 = inlined_call_operand.vmem [shape: f32[1,128], index: 2, kind: input, shape index: {}]   ;;  %s356_s3 = inlined_call_operand.hbm [shape: bf16[128,128], index: 3, kind: input, shape index: {}]   ;;  %s357_s4 = inlined_call_operand.vmem [shape: f32[1,128], index: 4, kind: input, shape index: {}]   ;;  %s358_s5 = inlined_call_operand.hbm [shape: f32[8,10], index: 5, kind: output, shape index: {}]  }
   0x1   :  { %11 = vsyncpa [#allocation4], 0  ;;  %s22_s20 = sshll.u32 %s356_s3, 4  ;;  %s298_s21 = smov [#allocation2]   ;;  %s23_s20 = int_to_ptr.hbm [resolvable:$true] %s22_s20 }
   0x2   :  { %s24_s22 = sshll.u32 %s298_s21, 4  ;;  %s299_s23 = smov 64   ;;  %s25_s22 = int_to_ptr.vmem [resolvable:$true] %s24_s22 }
   0x3   :  { %s300_s24 = smov 4  }
   0x4   :  { %30 = dma.hbm_to_vmem [thread:$0]  %s23_s20, 1024, %s25_s22, [#allocation3], %s299_s23, %s299_s23, %s300_s24  }
   0x5   :  { %294 = dma.done.wait [#allocation3], 1024  }
   0x6   :  { %295 = vsyncadd [#allocation3], 4294966272  ;;  %v301_v0 = vmov 0   ;;  %v302_v1 = vmov 2   ;;  %v37_v2 = vld [vmem:[%s353_s0] sm:$0xff]  ;;  %v228_v3 = vld [vmem:[#allocation2 + $0x38] sm:$0xff] }
   0x7   :  { %236 = vset.pattern.permute.xlu0 %v301_v0  ;;  %238 = vset.pattern.permute.xlu1 %v302_v1  ;;  %v227_v4 = vld [vmem:[#allocation2 + $0x30] sm:$0xff]  ;;  %v226_v5 = vld [vmem:[#allocation2 + $0x28] sm:$0xff]  ;;  %v303_v6 = vmov 1   ;;  %v225_v7 = vld [vmem:[#allocation2 + $0x20] sm:$0xff]  ;;  %s179_s7 = sshll.u32 %s358_s5, 4  ;;  %vm170_vm4 = vcmask 80896   ;;  %s180_s7 = int_to_ptr.hbm [resolvable:$true] %s179_s7 }
   0x8   :  { %42 = vperm.xlu0 %236, %v37_v2   ;;  %59 = vperm.xlu1 %238, %v37_v2   ;;  %v224_v8 = vld [vmem:[#allocation2 + $0x18] sm:$0xff]  ;;  %v223_v9 = vld [vmem:[#allocation2 + $0x10] sm:$0xff]  ;;  %v222_v10 = vld [vmem:[#allocation2 + $0x8] sm:$0xff] }
   0x9   :  { %135 = vmatpush.bf16.msra.mxu0 %v228_v3  ;;  %v221_v11 = vld [vmem:[#allocation2] sm:$0xff] }
   0xa   :  { %v38_v12 = vld [vmem:[%s354_s1] sm:$0x7] }
   0xb   :  { %v45_v14 = vperm.slane %v38_v12, 0  ;;  %v240_v15 = vld [vmem:[%s355_s2] ss:$0 sm:$0xff]  ;;  %v55_v17 = vperm.slane %v38_v12, 1  ;;  %v62_v18 = vperm.slane %v38_v12, 2  ;;  %s304_s2 = smov [#allocation5]  }
   0xc   :  { %v241_v28 = vld [vmem:[%s357_s4] ss:$0 sm:$0xff]  ;;  %s177_s4 = sshll.u32 %s304_s2, 4  ;;  %s178_s4 = int_to_ptr.vmem [resolvable:$true] %s177_s4 }
   0xd   :  { %136 = vmatpush.bf16.msra.mxu0 %v227_v4 }
  0x10   :  { %237 = vset.pattern.permute.xlu0 %v303_v6 }
  0x11   :  { %52 = vperm.xlu0 %237, %v37_v2   ;;  %137 = vmatpush.bf16.msra.mxu0 %v226_v5 }
  0x15   :  { %138 = vmatpush.bf16.msra.mxu0 %v225_v7 }
  0x19   :  { %239 = vset.pattern.permute.xlu0 %v302_v1  ;;  %139 = vmatpush.bf16.msra.mxu0 %v224_v8 }
  0x1d   :  { %140 = vmatpush.bf16.msra.mxu0 %v223_v9 }
  0x21   :  { %141 = vmatpush.bf16.msra.mxu0 %v222_v10 }
  0x25   :  { %142 = vmatpush.bf16.msra.mxu0 %v221_v11 }
  0x7a   :  { %v43_v13 = vpop.permute.xlu0 %42  ;;  %v60_v19 = vpop.permute.xlu1 %59 }
  0x7b   :  { %v46_v16 = vmul.f32 %v45_v14, %v43_v13  ;;  %v63_v23 = vmul.f32 %v62_v18, %v60_v19 }
  0x7d   :  { %v50_v21 = vadd.f32 %v240_v15, %v46_v16 }
  0x83   :  { %v53_v20 = vpop.permute.xlu0 %52 }
  0x84   :  { %v56_v22 = vmul.f32 %v55_v17, %v53_v20 }
  0x86   :  { %v57_v24 = vadd.f32 %v56_v22, %v50_v21 }
  0x88   :  { %v64_v25 = vadd.f32 %v63_v23, %v57_v24 }
  0x8a   :  { %v65_v26 = vmax.f32 %v64_v25, 0.0 }
  0x8c   :  { %v66_v27 = vpack.c.bf16 %v65_v26, %v65_v26 }
  0x8e   :  { %143 = vmatmul.bf16.vlgmr.msra.gmra.mxu0 %v66_v27 }
 0x10b   :  { %v144_v29 = vpop.f32.mrf.mxu0 }
 0x10c   :  { %v145_v30 = vadd.f32 %v241_v28, %v144_v29 }
 0x10e   :  { %148 = vmax.xlane.f32.xlu1 %v145_v30 }
 0x113   :  { %v146_v31 = vpop.f32.mrf.mxu0 }
 0x181   :  { %v149_v32 = vpop.xlane.xlu1 %148 }
 0x182   :  { %v150_v33 = vsub.f32 %v145_v30, %v149_v32 }
 0x184   :  { %v151_v34 = vmul.f32 1.442695, %v150_v33 }
 0x186   :  { %242 = vpow2.f32 %v151_v34 }
 0x18c   :  { %v243_v35 = vpop.eup %242 }
 0x18d   :  { %153 = vadd.xlane.f32.xlu2 %v243_v35 }
 0x200   :  { %v154_v36 = vpop.xlane.xlu2 %153 }
 0x201   :  { %244 = vrcp.f32 %v154_v36  ;;  %v166_v40 = vand.u32 2147483648, %v154_v36  ;;  %v164_v42 = vand.u32 2147483647, %v154_v36  ;;  %vm160_vm1 = vweird.f32 %v154_v36 }
 0x203   :  { %v167_v44 = vor.u32 1.1754944e-38, %v166_v40  ;;  %vm165_vm3 = vcmp.eq.f32.partialorder %v164_v42, 8.507059e+37 }
 0x207   :  { %v245_v37 = vpop.eup %244 }
 0x208   :  { %v156_v38 = vmul.f32 %v245_v37, %v154_v36  ;;  %vm161_vm0 = vweird.f32 %v245_v37 }
 0x209   :  { %vm162_vm2 = vmor %vm160_vm1, %vm161_vm0 }
 0x20a   :  { %v157_v39 = vsub.f32 1.0, %v156_v38 }
 0x20c   :  { %v158_v41 = vmul.f32 %v245_v37, %v157_v39 }
 0x20e   :  { %v159_v43 = vadd.f32 %v245_v37, %v158_v41 }
 0x210   :  { %v163_v45 = vsel %vm162_vm2, %v245_v37, %v159_v43 }
 0x211   :  { %v168_v46 = vsel %vm165_vm3, %v167_v44, %v163_v45 }
 0x212   :  { %v169_v47 = vmul.f32 %v243_v35, %v168_v46 }
 0x214   :  { %171 = vst.msk [vmem:[#allocation5] sm:$0xff] %vm170_vm4, %v169_v47 }
 0x215   :  { %182 = dma.vmem_to_hbm [thread:$0]  %s178_s4, 128, %s180_s7, [#allocation4]  }
 0x216   :  { %296 = dma.done.wait [#allocation4], 128  }
 0x217   :  { %297 = vsyncadd [#allocation4], 4294967168 }
 0x218   :  { %187 = vsyncpa [#allocation3], 1 }
 0x219   :  { %188 = vsyncpa [#allocation4], 1 }

</bundles_post_ra>
